<compile_context>
chip_gen: v5e
topology: v5e:2x2
jax: 0.10.0
libtpu: 0.0.40
codegen_flags: <defaults>
</compile_context>

<pallas_src>
import numpy as np
import jax
import jax.numpy as jnp
from jax import lax
from jax.experimental import pallas as pl
from jax.experimental.pallas import tpu as pltpu


# ---------------------------------------------------------------------------
# Fused Pallas kernel: full MAML inner loop for ONE task (one grid point)
# ---------------------------------------------------------------------------
def _make_maml_inner_kernel(N, F, H, C, supportsz, update_step, update_lr):
    inv_s = 1.0 / float(supportsz)
    lr = float(update_lr)

    dn_t = (((0,), (0,)), ((), ()))   # A^T @ B  (contract leading dims)
    dn_r = (((1,), (1,)), ((), ()))   # A @ B^T  (contract trailing dims)

    def kernel(x_ref, adj_ref, oh_ref, w1_ref, b1_ref, w2_ref, b2_ref, out_ref):
        x = x_ref[0]          # (N, F)
        a = adj_ref[0]        # (N, N)
        oh = oh_ref[0]        # (N, C)  one-hot labels
        w1 = w1_ref[...]      # (F, H)
        b1 = b1_ref[...]      # (1, H)
        w2 = w2_ref[...]      # (H, C)
        b2 = b2_ref[...]      # (1, C)

        # support-row mask (rows < supportsz); iota must be >= 2D on TPU
        rows = lax.broadcasted_iota(jnp.int32, (N, 1), 0)
        smask = (rows < supportsz).astype(jnp.float32)

        # adj @ x is parameter-independent -> hoisted out of the update loop
        ax = jnp.dot(a, x, preferred_element_type=jnp.float32)          # (N, F)

        def fwd(w1, b1, w2, b2):
            z1 = jnp.dot(ax, w1, preferred_element_type=jnp.float32) + b1   # (N, H)
            h1 = jnp.maximum(z1, 0.0)
            ah1 = jnp.dot(a, h1, preferred_element_type=jnp.float32)        # (N, H)
            logits = jnp.dot(ah1, w2, preferred_element_type=jnp.float32) + b2
            return logits, z1, ah1

        logits, z1, ah1 = fwd(w1, b1, w2, b2)
        out_ref[0, 0, :, :] = logits

        # unrolled inner-loop SGD on the fast weights (update_step is static)
        for k in range(update_step):
            # dLoss/dlogits of CE averaged over the support rows (0 elsewhere)
            m = jnp.max(logits, axis=1, keepdims=True)
            e = jnp.exp(logits - m)
            p = e / jnp.sum(e, axis=1, keepdims=True)
            g = (p - oh) * smask * inv_s                                 # (N, C)

            # analytic backward; note W2 here is the pre-update value, and the
            # (A^T g) @ W2^T contraction order is kept (C < H => cheaper).
            dw2 = lax.dot_general(ah1, g, dn_t, preferred_element_type=jnp.float32)
            db2 = jnp.sum(g, axis=0, keepdims=True)
            atg = lax.dot_general(a, g, dn_t, preferred_element_type=jnp.float32)
            dh1 = lax.dot_general(atg, w2, dn_r, preferred_element_type=jnp.float32)
            dz1 = jnp.where(z1 > 0.0, dh1, 0.0)   # ReLU grad on pre-activation z1
            dw1 = lax.dot_general(ax, dz1, dn_t, preferred_element_type=jnp.float32)
            db1 = jnp.sum(dz1, axis=0, keepdims=True)

            # fused SGD fast-weight update (fast weights never leave the kernel)
            w1 = w1 - lr * dw1
            b1 = b1 - lr * db1
            w2 = w2 - lr * dw2
            b2 = b2 - lr * db2

            logits, z1, ah1 = fwd(w1, b1, w2, b2)
            out_ref[0, k + 1, :, :] = logits

    return kernel


# ---------------------------------------------------------------------------
# pallas_call wrapper + fused jit epilogue (losses / accuracies)
# ---------------------------------------------------------------------------
def build_meta_forward(N, F, H, C, task_num, supportsz, update_step, update_lr):
    steps_p1 = update_step + 1
    kernel = _make_maml_inner_kernel(N, F, H, C, supportsz, update_step, update_lr)

    grid_spec = pltpu.PrefetchScalarGridSpec(
        num_scalar_prefetch=0,
        grid=(task_num,),
        in_specs=[
            pl.BlockSpec((1, N, F), lambda i: (i, 0, 0)),   # x
            pl.BlockSpec((1, N, N), lambda i: (i, 0, 0)),   # adj
            pl.BlockSpec((1, N, C), lambda i: (i, 0, 0)),   # one-hot labels
            pl.BlockSpec((F, H), lambda i: (0, 0)),         # W1 (shared across tasks)
            pl.BlockSpec((1, H), lambda i: (0, 0)),         # b1
            pl.BlockSpec((H, C), lambda i: (0, 0)),         # W2
            pl.BlockSpec((1, C), lambda i: (0, 0)),         # b2
        ],
        out_specs=pl.BlockSpec((1, steps_p1, N, C), lambda i: (i, 0, 0, 0)),
    )

    inner = pl.pallas_call(
        kernel,
        out_shape=jax.ShapeDtypeStruct((task_num, steps_p1, N, C), jnp.float32),
        grid_spec=grid_spec,
        compiler_params=pltpu.CompilerParams(
            dimension_semantics=("parallel",)),   # tasks -> both TCs on v7x
    )

    @jax.jit
    def forward(x, adj, labels, w1, b1, w2, b2):
        onehot = jax.nn.one_hot(labels, C, dtype=jnp.float32)            # (T, N, C)
        logits_all = inner(x, adj, onehot, w1, b1, w2, b2)               # (T, S, N, C)

        ql = logits_all[:, :, supportsz:, :]                             # (T, S, Q, C)
        qy = labels[:, supportsz:]                                       # (T, Q)
        oh_q = jax.nn.one_hot(qy, C, dtype=jnp.float32)                  # (T, Q, C)

        lse = jax.nn.logsumexp(ql, axis=-1)                              # (T, S, Q)
        picked = jnp.sum(ql * oh_q[:, None, :, :], axis=-1)              # (T, S, Q)
        losses_q = jnp.sum(jnp.mean(lse - picked, axis=-1), axis=0)      # (S,)

        preds = jnp.argmax(ql, axis=-1)                                  # (T, S, Q)
        corrects = jnp.sum(preds == qy[:, None, :], axis=(0, 2))         # (S,)

        loss_q = losses_q[-1] / task_num
        return corrects, loss_q

    return forward


# ---------------------------------------------------------------------------
# Meta (MAML) module
# ---------------------------------------------------------------------------
class MetaPallas:
    def __init__(self, args, key):
        self.update_lr = args.update_lr
        self.meta_lr = args.meta_lr
        self.n_way = args.n_way
        self.k_spt = args.k_spt
        self.k_qry = args.k_qry
        self.task_num = args.task_num
        self.update_step = args.update_step
        self.nfeat = args.nfeat
        self.nhid = args.nhid
        self.dropout = args.dropout   # 0.0 -> identity (omitted)

        self.supportsz = self.n_way * self.k_spt
        self.querysz = self.n_way * self.k_qry

        k1, k2, k3, k4 = jax.random.split(key, 4)
        s1 = 1.0 / np.sqrt(self.nhid)
        s2 = 1.0 / np.sqrt(self.n_way)
        self.params = [
            jax.random.uniform(k1, (self.nfeat, self.nhid), jnp.float32, -s1, s1),
            jax.random.uniform(k2, (1, self.nhid), jnp.float32, -s1, s1),
            jax.random.uniform(k3, (self.nhid, self.n_way), jnp.float32, -s2, s2),
            jax.random.uniform(k4, (1, self.n_way), jnp.float32, -s2, s2),
        ]
        self._fwd = None

    def forward(self, x, adj, labels):
        T, N, F = x.shape
        if self._fwd is None:
            self._fwd = build_meta_forward(
                N, F, self.nhid, self.n_way, T, self.supportsz,
                self.update_step, self.update_lr)

        corrects, loss_q = self._fwd(x, adj, labels, *self.params)
        # TODO(synk): meta Adam step (loss_q.backward + meta_optim.step) needs the
        # second-order meta-gradient through the inner loop; not applied here.
        accs = np.asarray(corrects, dtype=np.float64) / (self.querysz * self.task_num)
        return accs, loss_q


# ---------------------------------------------------------------------------
# Pure-JAX autodiff reference of the same inner loop (correctness check)
# ---------------------------------------------------------------------------
def reference_loss(x, adj, labels, params, supportsz, update_step, update_lr):
    task_num = x.shape[0]

    def net(p, xi, ai):
        w1, b1, w2, b2 = p
        h1 = jax.nn.relu(ai @ (xi @ w1) + b1)
        return ai @ (h1 @ w2) + b2

    def ce(logits, y):
        lse = jax.nn.logsumexp(logits, axis=1)
        picked = jnp.take_along_axis(logits, y[:, None], axis=1)[:, 0]
        return jnp.mean(lse - picked)

    total = 0.0
    for i in range(task_num):
        xi, ai, yi = x[i], adj[i], labels[i]
        p = list(params)
        spt_loss = lambda pp: ce(net(pp, xi, ai)[:supportsz], yi[:supportsz])
        for _ in range(update_step):
            grads = jax.grad(spt_loss)(p)
            p = [w - update_lr * g for w, g in zip(p, grads)]
        total = total + ce(net(p, xi, ai)[supportsz:], yi[supportsz:])
    return total / task_num


# ---------------------------------------------------------------------------
# Deterministic synthetic data + driver
# ---------------------------------------------------------------------------
def make_adj(key, n):
    a = (jax.random.uniform(key, (n, n)) < 0.3).astype(jnp.float32)
    a = jnp.maximum(a, a.T)
    a = jnp.minimum(a + jnp.eye(n, dtype=jnp.float32), 1.0)
    d = jnp.sum(a, axis=1)
    dinv = 1.0 / jnp.sqrt(d)
    return a * dinv[:, None] * dinv[None, :]


if __name__ == "__main__":
    class Args:
        update_lr = 0.05
        meta_lr = 1e-3
        n_way = 4
        k_spt = 2
        test_k_spt = 2
        k_qry = 2
        num_qry = 8
        task_num = 2
        update_step = 3
        update_step_test = 3
        nfeat = 32
        nhid = 16
        dropout = 0.0

    args = Args()
    N = args.n_way * (args.k_spt + args.k_qry)   # nodes per task graph = 16

    key = jax.random.PRNGKey(0)
    kx, ka, kl, kp = jax.random.split(key, 4)

    x = jax.random.normal(kx, (args.task_num, N, args.nfeat), dtype=jnp.float32)
    adj = jnp.stack([make_adj(k, N) for k in jax.random.split(ka, args.task_num)])
    # support nodes first, then query nodes (matches labels[:supportsz] slicing)
    labels = jax.random.randint(kl, (args.task_num, N), 0, args.n_way, dtype=jnp.int32)

    meta = MetaPallas(args, kp)
    accs, loss_q = meta.forward(x, adj, labels)
    loss_q = jax.block_until_ready(loss_q)

    # correctness: fused-kernel meta objective vs pure-JAX autodiff reference
    with jax.default_matmul_precision("highest"):
        loss_ref = float(reference_loss(x, adj, labels, meta.params,
                                        meta.supportsz, args.update_step,
                                        args.update_lr))

    assert np.isfinite(float(loss_q))
    assert accs.shape == (args.update_step + 1,)
    assert np.all((accs >= 0.0) & (accs <= 1.0))
    np.testing.assert_allclose(float(loss_q), loss_ref, rtol=2e-2, atol=2e-2)
    print("KERNEL_OK")
</pallas_src>

<mosaic_0001>
module attributes {stable_mosaic.version = 11 : i64} {
  func.func @kernel(%arg0: i32, %arg1: memref<1x16x32xf32, #tpu.memory_space<vmem>>, %arg2: memref<1x16x16xf32, #tpu.memory_space<vmem>>, %arg3: memref<1x16x4xf32, #tpu.memory_space<vmem>>, %arg4: memref<32x16xf32, #tpu.memory_space<vmem>>, %arg5: memref<1x16xf32, #tpu.memory_space<vmem>>, %arg6: memref<16x4xf32, #tpu.memory_space<vmem>>, %arg7: memref<1x4xf32, #tpu.memory_space<vmem>>, %arg8: memref<1x4x16x4xf32, #tpu.memory_space<vmem>>) attributes {dimension_semantics = [#tpu.dimension_semantics<parallel>], iteration_bounds = array<i64: 2>, scalar_prefetch = 0 : i64, scratch_operands = 0 : i64, tpu.core_type = #tpu.core_type<tc>, window_params = [{transform_indices = @transform_0, window_bounds = array<i64: 1, 16, 32>}, {transform_indices = @transform_1, window_bounds = array<i64: 1, 16, 16>}, {transform_indices = @transform_2, window_bounds = array<i64: 1, 16, 4>}, {pipeline_mode = #tpu.pipeline_mode<synchronous>, transform_indices = @transform_3, window_bounds = array<i64: 32, 16>}, {pipeline_mode = #tpu.pipeline_mode<synchronous>, transform_indices = @transform_4, window_bounds = array<i64: 1, 16>}, {pipeline_mode = #tpu.pipeline_mode<synchronous>, transform_indices = @transform_5, window_bounds = array<i64: 16, 4>}, {pipeline_mode = #tpu.pipeline_mode<synchronous>, transform_indices = @transform_6, window_bounds = array<i64: 1, 4>}, {transform_indices = @transform_7, window_bounds = array<i64: 1, 4, 16, 4>}]} {
    %c0 = arith.constant 0 : index
    %c0_0 = arith.constant 0 : index
    %c0_1 = arith.constant 0 : index
    %0 = vector.load %arg1[%c0, %c0_0, %c0_1] : memref<1x16x32xf32, #tpu.memory_space<vmem>>, vector<1x16x32xf32>
    %1 = vector.shape_cast %0 : vector<1x16x32xf32> to vector<16x32xf32>
    %c0_2 = arith.constant 0 : index
    %c0_3 = arith.constant 0 : index
    %c0_4 = arith.constant 0 : index
    %2 = vector.load %arg2[%c0_2, %c0_3, %c0_4] : memref<1x16x16xf32, #tpu.memory_space<vmem>>, vector<1x16x16xf32>
    %3 = vector.shape_cast %2 : vector<1x16x16xf32> to vector<16x16xf32>
    %c0_5 = arith.constant 0 : index
    %c0_6 = arith.constant 0 : index
    %c0_7 = arith.constant 0 : index
    %4 = vector.load %arg3[%c0_5, %c0_6, %c0_7] : memref<1x16x4xf32, #tpu.memory_space<vmem>>, vector<1x16x4xf32>
    %5 = vector.shape_cast %4 : vector<1x16x4xf32> to vector<16x4xf32>
    %c0_8 = arith.constant 0 : index
    %c0_9 = arith.constant 0 : index
    %6 = vector.load %arg4[%c0_8, %c0_9] : memref<32x16xf32, #tpu.memory_space<vmem>>, vector<32x16xf32>
    %c0_10 = arith.constant 0 : index
    %c0_11 = arith.constant 0 : index
    %7 = vector.load %arg5[%c0_10, %c0_11] : memref<1x16xf32, #tpu.memory_space<vmem>>, vector<1x16xf32>
    %c0_12 = arith.constant 0 : index
    %c0_13 = arith.constant 0 : index
    %8 = vector.load %arg6[%c0_12, %c0_13] : memref<16x4xf32, #tpu.memory_space<vmem>>, vector<16x4xf32>
    %c0_14 = arith.constant 0 : index
    %c0_15 = arith.constant 0 : index
    %9 = vector.load %arg7[%c0_14, %c0_15] : memref<1x4xf32, #tpu.memory_space<vmem>>, vector<1x4xf32>
    %10 = tpu.iota {dimensions = array<i32: 0>} : vector<16x1xi32>
    %c8_i32 = arith.constant 8 : i32
    %11 = vector.broadcast %c8_i32 : i32 to vector<16x1xi32>
    %12 = arith.cmpi slt, %10, %11 : vector<16x1xi32>
    %13 = arith.extui %12 : vector<16x1xi1> to vector<16x1xi32>
    %14 = arith.sitofp %13 : vector<16x1xi32> to vector<16x1xf32>
    %cst = arith.constant dense<0.000000e+00> : vector<16x32xf32>
    %15 = tpu.matmul %3, %1, %cst {dimension_numbers = #tpu.dot_dimension_numbers<[1], [0], [0], [1], [0, 0, 1, 1], [], []>} : vector<16x16xf32>, vector<16x32xf32>, vector<16x32xf32> -> vector<16x32xf32>
    %cst_16 = arith.constant dense<0.000000e+00> : vector<16x16xf32>
    %16 = tpu.matmul %15, %6, %cst_16 {dimension_numbers = #tpu.dot_dimension_numbers<[1], [0], [0], [1], [0, 0, 1, 1], [], []>} : vector<16x32xf32>, vector<32x16xf32>, vector<16x16xf32> -> vector<16x16xf32>
    %17 = vector.broadcast %7 : vector<1x16xf32> to vector<16x16xf32>
    %18 = arith.addf %16, %17 : vector<16x16xf32>
    %cst_17 = arith.constant 0.000000e+00 : f32
    %19 = vector.broadcast %cst_17 : f32 to vector<16x16xf32>
    %20 = arith.maximumf %18, %19 : vector<16x16xf32>
    %cst_18 = arith.constant dense<0.000000e+00> : vector<16x16xf32>
    %21 = tpu.matmul %3, %20, %cst_18 {dimension_numbers = #tpu.dot_dimension_numbers<[1], [0], [0], [1], [0, 0, 1, 1], [], []>} : vector<16x16xf32>, vector<16x16xf32>, vector<16x16xf32> -> vector<16x16xf32>
    %cst_19 = arith.constant dense<0.000000e+00> : vector<16x4xf32>
    %22 = tpu.matmul %21, %8, %cst_19 {dimension_numbers = #tpu.dot_dimension_numbers<[1], [0], [0], [1], [0, 0, 1, 1], [], []>} : vector<16x16xf32>, vector<16x4xf32>, vector<16x4xf32> -> vector<16x4xf32>
    %23 = vector.broadcast %9 : vector<1x4xf32> to vector<16x4xf32>
    %24 = arith.addf %22, %23 : vector<16x4xf32>
    %c0_20 = arith.constant 0 : index
    %c0_21 = arith.constant 0 : index
    %c0_22 = arith.constant 0 : index
    %c0_23 = arith.constant 0 : index
    %25 = vector.load %arg8[%c0_20, %c0_21, %c0_22, %c0_23] : memref<1x4x16x4xf32, #tpu.memory_space<vmem>>, vector<1x1x16x4xf32>
    %26 = vector.shape_cast %25 : vector<1x1x16x4xf32> to vector<16x4xf32>
    %27 = vector.shape_cast %24 : vector<16x4xf32> to vector<1x1x16x4xf32>
    tpu.vector_store %arg8[%c0_20, %c0_21, %c0_22, %c0_23], %27 {strides = array<i32>} : memref<1x4x16x4xf32, #tpu.memory_space<vmem>>, vector<1x1x16x4xf32>,
    %cst_24 = arith.constant dense<0xFF800000> : vector<16xf32>
    %28 = vector.multi_reduction <maximumf>, %24, %cst_24 [1] : vector<16x4xf32> to vector<16xf32>
    %29 = vector.shape_cast %28 : vector<16xf32> to vector<16x1xf32>
    %30 = vector.broadcast %29 : vector<16x1xf32> to vector<16x4xf32>
    %31 = arith.subf %24, %30 : vector<16x4xf32>
    %32 = math.exp %31 : vector<16x4xf32>
    %cst_25 = arith.constant dense<0.000000e+00> : vector<16xf32>
    %33 = vector.multi_reduction <add>, %32, %cst_25 [1] : vector<16x4xf32> to vector<16xf32>
    %34 = vector.shape_cast %33 : vector<16xf32> to vector<16x1xf32>
    %35 = vector.broadcast %34 : vector<16x1xf32> to vector<16x4xf32>
    %36 = arith.divf %32, %35 : vector<16x4xf32>
    %37 = arith.subf %36, %5 : vector<16x4xf32>
    %38 = vector.broadcast %14 : vector<16x1xf32> to vector<16x4xf32>
    %39 = arith.mulf %37, %38 : vector<16x4xf32>
    %cst_26 = arith.constant 1.250000e-01 : f32
    %40 = vector.broadcast %cst_26 : f32 to vector<16x4xf32>
    %41 = arith.mulf %39, %40 : vector<16x4xf32>
    %cst_27 = arith.constant dense<0.000000e+00> : vector<16x4xf32>
    %42 = tpu.matmul %21, %41, %cst_27 {dimension_numbers = #tpu.dot_dimension_numbers<[0], [0], [1], [1], [0, 1, 1, 1], [], []>} : vector<16x16xf32>, vector<16x4xf32>, vector<16x4xf32> -> vector<16x4xf32>
    %cst_28 = arith.constant dense<0.000000e+00> : vector<4xf32>
    %43 = vector.multi_reduction <add>, %41, %cst_28 [0] : vector<16x4xf32> to vector<4xf32>
    %44 = vector.shape_cast %43 : vector<4xf32> to vector<1x4xf32>
    %cst_29 = arith.constant dense<0.000000e+00> : vector<16x4xf32>
    %45 = tpu.matmul %3, %41, %cst_29 {dimension_numbers = #tpu.dot_dimension_numbers<[0], [0], [1], [1], [0, 1, 1, 1], [], []>} : vector<16x16xf32>, vector<16x4xf32>, vector<16x4xf32> -> vector<16x4xf32>
    %cst_30 = arith.constant dense<0.000000e+00> : vector<16x16xf32>
    %46 = tpu.matmul %45, %8, %cst_30 {dimension_numbers = #tpu.dot_dimension_numbers<[1], [1], [0], [0], [0, 0, 1, 0], [], []>} : vector<16x4xf32>, vector<16x4xf32>, vector<16x16xf32> -> vector<16x16xf32>
    %cst_31 = arith.constant 0.000000e+00 : f32
    %47 = vector.broadcast %cst_31 : f32 to vector<16x16xf32>
    %48 = arith.cmpf ogt, %18, %47 : vector<16x16xf32>
    %cst_32 = arith.constant 0.000000e+00 : f32
    %49 = vector.broadcast %cst_32 : f32 to vector<16x16xf32>
    %50 = arith.select %48, %46, %49 : vector<16x16xi1>, vector<16x16xf32>
    %cst_33 = arith.constant dense<0.000000e+00> : vector<32x16xf32>
    %51 = tpu.matmul %15, %50, %cst_33 {dimension_numbers = #tpu.dot_dimension_numbers<[0], [0], [1], [1], [0, 1, 1, 1], [], []>} : vector<16x32xf32>, vector<16x16xf32>, vector<32x16xf32> -> vector<32x16xf32>
    %cst_34 = arith.constant dense<0.000000e+00> : vector<16xf32>
    %52 = vector.multi_reduction <add>, %50, %cst_34 [0] : vector<16x16xf32> to vector<16xf32>
    %53 = vector.shape_cast %52 : vector<16xf32> to vector<1x16xf32>
    %cst_35 = arith.constant 5.000000e-02 : f32
    %54 = vector.broadcast %cst_35 : f32 to vector<32x16xf32>
    %55 = arith.mulf %54, %51 : vector<32x16xf32>
    %56 = arith.subf %6, %55 : vector<32x16xf32>
    %cst_36 = arith.constant 5.000000e-02 : f32
    %57 = vector.broadcast %cst_36 : f32 to vector<1x16xf32>
    %58 = arith.mulf %57, %53 : vector<1x16xf32>
    %59 = arith.subf %7, %58 : vector<1x16xf32>
    %cst_37 = arith.constant 5.000000e-02 : f32
    %60 = vector.broadcast %cst_37 : f32 to vector<16x4xf32>
    %61 = arith.mulf %60, %42 : vector<16x4xf32>
    %62 = arith.subf %8, %61 : vector<16x4xf32>
    %cst_38 = arith.constant 5.000000e-02 : f32
    %63 = vector.broadcast %cst_38 : f32 to vector<1x4xf32>
    %64 = arith.mulf %63, %44 : vector<1x4xf32>
    %65 = arith.subf %9, %64 : vector<1x4xf32>
    %cst_39 = arith.constant dense<0.000000e+00> : vector<16x16xf32>
    %66 = tpu.matmul %15, %56, %cst_39 {dimension_numbers = #tpu.dot_dimension_numbers<[1], [0], [0], [1], [0, 0, 1, 1], [], []>} : vector<16x32xf32>, vector<32x16xf32>, vector<16x16xf32> -> vector<16x16xf32>
    %67 = vector.broadcast %59 : vector<1x16xf32> to vector<16x16xf32>
    %68 = arith.addf %66, %67 : vector<16x16xf32>
    %cst_40 = arith.constant 0.000000e+00 : f32
    %69 = vector.broadcast %cst_40 : f32 to vector<16x16xf32>
    %70 = arith.maximumf %68, %69 : vector<16x16xf32>
    %cst_41 = arith.constant dense<0.000000e+00> : vector<16x16xf32>
    %71 = tpu.matmul %3, %70, %cst_41 {dimension_numbers = #tpu.dot_dimension_numbers<[1], [0], [0], [1], [0, 0, 1, 1], [], []>} : vector<16x16xf32>, vector<16x16xf32>, vector<16x16xf32> -> vector<16x16xf32>
    %cst_42 = arith.constant dense<0.000000e+00> : vector<16x4xf32>
    %72 = tpu.matmul %71, %62, %cst_42 {dimension_numbers = #tpu.dot_dimension_numbers<[1], [0], [0], [1], [0, 0, 1, 1], [], []>} : vector<16x16xf32>, vector<16x4xf32>, vector<16x4xf32> -> vector<16x4xf32>
    %73 = vector.broadcast %65 : vector<1x4xf32> to vector<16x4xf32>
    %74 = arith.addf %72, %73 : vector<16x4xf32>
    %c0_43 = arith.constant 0 : index
    %c1 = arith.constant 1 : index
    %c0_44 = arith.constant 0 : index
    %c0_45 = arith.constant 0 : index
    %75 = vector.load %arg8[%c0_43, %c1, %c0_44, %c0_45] : memref<1x4x16x4xf32, #tpu.memory_space<vmem>>, vector<1x1x16x4xf32>
    %76 = vector.shape_cast %75 : vector<1x1x16x4xf32> to vector<16x4xf32>
    %77 = vector.shape_cast %74 : vector<16x4xf32> to vector<1x1x16x4xf32>
    tpu.vector_store %arg8[%c0_43, %c1, %c0_44, %c0_45], %77 {strides = array<i32>} : memref<1x4x16x4xf32, #tpu.memory_space<vmem>>, vector<1x1x16x4xf32>,
    %cst_46 = arith.constant dense<0xFF800000> : vector<16xf32>
    %78 = vector.multi_reduction <maximumf>, %74, %cst_46 [1] : vector<16x4xf32> to vector<16xf32>
    %79 = vector.shape_cast %78 : vector<16xf32> to vector<16x1xf32>
    %80 = vector.broadcast %79 : vector<16x1xf32> to vector<16x4xf32>
    %81 = arith.subf %74, %80 : vector<16x4xf32>
    %82 = math.exp %81 : vector<16x4xf32>
    %cst_47 = arith.constant dense<0.000000e+00> : vector<16xf32>
    %83 = vector.multi_reduction <add>, %82, %cst_47 [1] : vector<16x4xf32> to vector<16xf32>
    %84 = vector.shape_cast %83 : vector<16xf32> to vector<16x1xf32>
    %85 = vector.broadcast %84 : vector<16x1xf32> to vector<16x4xf32>
    %86 = arith.divf %82, %85 : vector<16x4xf32>
    %87 = arith.subf %86, %5 : vector<16x4xf32>
    %88 = vector.broadcast %14 : vector<16x1xf32> to vector<16x4xf32>
    %89 = arith.mulf %87, %88 : vector<16x4xf32>
    %cst_48 = arith.constant 1.250000e-01 : f32
    %90 = vector.broadcast %cst_48 : f32 to vector<16x4xf32>
    %91 = arith.mulf %89, %90 : vector<16x4xf32>
    %cst_49 = arith.constant dense<0.000000e+00> : vector<16x4xf32>
    %92 = tpu.matmul %71, %91, %cst_49 {dimension_numbers = #tpu.dot_dimension_numbers<[0], [0], [1], [1], [0, 1, 1, 1], [], []>} : vector<16x16xf32>, vector<16x4xf32>, vector<16x4xf32> -> vector<16x4xf32>
    %cst_50 = arith.constant dense<0.000000e+00> : vector<4xf32>
    %93 = vector.multi_reduction <add>, %91, %cst_50 [0] : vector<16x4xf32> to vector<4xf32>
    %94 = vector.shape_cast %93 : vector<4xf32> to vector<1x4xf32>
    %cst_51 = arith.constant dense<0.000000e+00> : vector<16x4xf32>
    %95 = tpu.matmul %3, %91, %cst_51 {dimension_numbers = #tpu.dot_dimension_numbers<[0], [0], [1], [1], [0, 1, 1, 1], [], []>} : vector<16x16xf32>, vector<16x4xf32>, vector<16x4xf32> -> vector<16x4xf32>
    %cst_52 = arith.constant dense<0.000000e+00> : vector<16x16xf32>
    %96 = tpu.matmul %95, %62, %cst_52 {dimension_numbers = #tpu.dot_dimension_numbers<[1], [1], [0], [0], [0, 0, 1, 0], [], []>} : vector<16x4xf32>, vector<16x4xf32>, vector<16x16xf32> -> vector<16x16xf32>
    %cst_53 = arith.constant 0.000000e+00 : f32
    %97 = vector.broadcast %cst_53 : f32 to vector<16x16xf32>
    %98 = arith.cmpf ogt, %68, %97 : vector<16x16xf32>
    %cst_54 = arith.constant 0.000000e+00 : f32
    %99 = vector.broadcast %cst_54 : f32 to vector<16x16xf32>
    %100 = arith.select %98, %96, %99 : vector<16x16xi1>, vector<16x16xf32>
    %cst_55 = arith.constant dense<0.000000e+00> : vector<32x16xf32>
    %101 = tpu.matmul %15, %100, %cst_55 {dimension_numbers = #tpu.dot_dimension_numbers<[0], [0], [1], [1], [0, 1, 1, 1], [], []>} : vector<16x32xf32>, vector<16x16xf32>, vector<32x16xf32> -> vector<32x16xf32>
    %cst_56 = arith.constant dense<0.000000e+00> : vector<16xf32>
    %102 = vector.multi_reduction <add>, %100, %cst_56 [0] : vector<16x16xf32> to vector<16xf32>
    %103 = vector.shape_cast %102 : vector<16xf32> to vector<1x16xf32>
    %cst_57 = arith.constant 5.000000e-02 : f32
    %104 = vector.broadcast %cst_57 : f32 to vector<32x16xf32>
    %105 = arith.mulf %104, %101 : vector<32x16xf32>
    %106 = arith.subf %56, %105 : vector<32x16xf32>
    %cst_58 = arith.constant 5.000000e-02 : f32
    %107 = vector.broadcast %cst_58 : f32 to vector<1x16xf32>
    %108 = arith.mulf %107, %103 : vector<1x16xf32>
    %109 = arith.subf %59, %108 : vector<1x16xf32>
    %cst_59 = arith.constant 5.000000e-02 : f32
    %110 = vector.broadcast %cst_59 : f32 to vector<16x4xf32>
    %111 = arith.mulf %110, %92 : vector<16x4xf32>
    %112 = arith.subf %62, %111 : vector<16x4xf32>
    %cst_60 = arith.constant 5.000000e-02 : f32
    %113 = vector.broadcast %cst_60 : f32 to vector<1x4xf32>
    %114 = arith.mulf %113, %94 : vector<1x4xf32>
    %115 = arith.subf %65, %114 : vector<1x4xf32>
    %cst_61 = arith.constant dense<0.000000e+00> : vector<16x16xf32>
    %116 = tpu.matmul %15, %106, %cst_61 {dimension_numbers = #tpu.dot_dimension_numbers<[1], [0], [0], [1], [0, 0, 1, 1], [], []>} : vector<16x32xf32>, vector<32x16xf32>, vector<16x16xf32> -> vector<16x16xf32>
    %117 = vector.broadcast %109 : vector<1x16xf32> to vector<16x16xf32>
    %118 = arith.addf %116, %117 : vector<16x16xf32>
    %cst_62 = arith.constant 0.000000e+00 : f32
    %119 = vector.broadcast %cst_62 : f32 to vector<16x16xf32>
    %120 = arith.maximumf %118, %119 : vector<16x16xf32>
    %cst_63 = arith.constant dense<0.000000e+00> : vector<16x16xf32>
    %121 = tpu.matmul %3, %120, %cst_63 {dimension_numbers = #tpu.dot_dimension_numbers<[1], [0], [0], [1], [0, 0, 1, 1], [], []>} : vector<16x16xf32>, vector<16x16xf32>, vector<16x16xf32> -> vector<16x16xf32>
    %cst_64 = arith.constant dense<0.000000e+00> : vector<16x4xf32>
    %122 = tpu.matmul %121, %112, %cst_64 {dimension_numbers = #tpu.dot_dimension_numbers<[1], [0], [0], [1], [0, 0, 1, 1], [], []>} : vector<16x16xf32>, vector<16x4xf32>, vector<16x4xf32> -> vector<16x4xf32>
    %123 = vector.broadcast %115 : vector<1x4xf32> to vector<16x4xf32>
    %124 = arith.addf %122, %123 : vector<16x4xf32>
    %c0_65 = arith.constant 0 : index
    %c2 = arith.constant 2 : index
    %c0_66 = arith.constant 0 : index
    %c0_67 = arith.constant 0 : index
    %125 = vector.load %arg8[%c0_65, %c2, %c0_66, %c0_67] : memref<1x4x16x4xf32, #tpu.memory_space<vmem>>, vector<1x1x16x4xf32>
    %126 = vector.shape_cast %125 : vector<1x1x16x4xf32> to vector<16x4xf32>
    %127 = vector.shape_cast %124 : vector<16x4xf32> to vector<1x1x16x4xf32>
    tpu.vector_store %arg8[%c0_65, %c2, %c0_66, %c0_67], %127 {strides = array<i32>} : memref<1x4x16x4xf32, #tpu.memory_space<vmem>>, vector<1x1x16x4xf32>,
    %cst_68 = arith.constant dense<0xFF800000> : vector<16xf32>
    %128 = vector.multi_reduction <maximumf>, %124, %cst_68 [1] : vector<16x4xf32> to vector<16xf32>
    %129 = vector.shape_cast %128 : vector<16xf32> to vector<16x1xf32>
    %130 = vector.broadcast %129 : vector<16x1xf32> to vector<16x4xf32>
    %131 = arith.subf %124, %130 : vector<16x4xf32>
    %132 = math.exp %131 : vector<16x4xf32>
    %cst_69 = arith.constant dense<0.000000e+00> : vector<16xf32>
    %133 = vector.multi_reduction <add>, %132, %cst_69 [1] : vector<16x4xf32> to vector<16xf32>
    %134 = vector.shape_cast %133 : vector<16xf32> to vector<16x1xf32>
    %135 = vector.broadcast %134 : vector<16x1xf32> to vector<16x4xf32>
    %136 = arith.divf %132, %135 : vector<16x4xf32>
    %137 = arith.subf %136, %5 : vector<16x4xf32>
    %138 = vector.broadcast %14 : vector<16x1xf32> to vector<16x4xf32>
    %139 = arith.mulf %137, %138 : vector<16x4xf32>
    %cst_70 = arith.constant 1.250000e-01 : f32
    %140 = vector.broadcast %cst_70 : f32 to vector<16x4xf32>
    %141 = arith.mulf %139, %140 : vector<16x4xf32>
    %cst_71 = arith.constant dense<0.000000e+00> : vector<16x4xf32>
    %142 = tpu.matmul %121, %141, %cst_71 {dimension_numbers = #tpu.dot_dimension_numbers<[0], [0], [1], [1], [0, 1, 1, 1], [], []>} : vector<16x16xf32>, vector<16x4xf32>, vector<16x4xf32> -> vector<16x4xf32>
    %cst_72 = arith.constant dense<0.000000e+00> : vector<4xf32>
    %143 = vector.multi_reduction <add>, %141, %cst_72 [0] : vector<16x4xf32> to vector<4xf32>
    %144 = vector.shape_cast %143 : vector<4xf32> to vector<1x4xf32>
    %cst_73 = arith.constant dense<0.000000e+00> : vector<16x4xf32>
    %145 = tpu.matmul %3, %141, %cst_73 {dimension_numbers = #tpu.dot_dimension_numbers<[0], [0], [1], [1], [0, 1, 1, 1], [], []>} : vector<16x16xf32>, vector<16x4xf32>, vector<16x4xf32> -> vector<16x4xf32>
    %cst_74 = arith.constant dense<0.000000e+00> : vector<16x16xf32>
    %146 = tpu.matmul %145, %112, %cst_74 {dimension_numbers = #tpu.dot_dimension_numbers<[1], [1], [0], [0], [0, 0, 1, 0], [], []>} : vector<16x4xf32>, vector<16x4xf32>, vector<16x16xf32> -> vector<16x16xf32>
    %cst_75 = arith.constant 0.000000e+00 : f32
    %147 = vector.broadcast %cst_75 : f32 to vector<16x16xf32>
    %148 = arith.cmpf ogt, %118, %147 : vector<16x16xf32>
    %cst_76 = arith.constant 0.000000e+00 : f32
    %149 = vector.broadcast %cst_76 : f32 to vector<16x16xf32>
    %150 = arith.select %148, %146, %149 : vector<16x16xi1>, vector<16x16xf32>
    %cst_77 = arith.constant dense<0.000000e+00> : vector<32x16xf32>
    %151 = tpu.matmul %15, %150, %cst_77 {dimension_numbers = #tpu.dot_dimension_numbers<[0], [0], [1], [1], [0, 1, 1, 1], [], []>} : vector<16x32xf32>, vector<16x16xf32>, vector<32x16xf32> -> vector<32x16xf32>
    %cst_78 = arith.constant dense<0.000000e+00> : vector<16xf32>
    %152 = vector.multi_reduction <add>, %150, %cst_78 [0] : vector<16x16xf32> to vector<16xf32>
    %153 = vector.shape_cast %152 : vector<16xf32> to vector<1x16xf32>
    %cst_79 = arith.constant 5.000000e-02 : f32
    %154 = vector.broadcast %cst_79 : f32 to vector<32x16xf32>
    %155 = arith.mulf %154, %151 : vector<32x16xf32>
    %156 = arith.subf %106, %155 : vector<32x16xf32>
    %cst_80 = arith.constant 5.000000e-02 : f32
    %157 = vector.broadcast %cst_80 : f32 to vector<1x16xf32>
    %158 = arith.mulf %157, %153 : vector<1x16xf32>
    %159 = arith.subf %109, %158 : vector<1x16xf32>
    %cst_81 = arith.constant 5.000000e-02 : f32
    %160 = vector.broadcast %cst_81 : f32 to vector<16x4xf32>
    %161 = arith.mulf %160, %142 : vector<16x4xf32>
    %162 = arith.subf %112, %161 : vector<16x4xf32>
    %cst_82 = arith.constant 5.000000e-02 : f32
    %163 = vector.broadcast %cst_82 : f32 to vector<1x4xf32>
    %164 = arith.mulf %163, %144 : vector<1x4xf32>
    %165 = arith.subf %115, %164 : vector<1x4xf32>
    %cst_83 = arith.constant dense<0.000000e+00> : vector<16x16xf32>
    %166 = tpu.matmul %15, %156, %cst_83 {dimension_numbers = #tpu.dot_dimension_numbers<[1], [0], [0], [1], [0, 0, 1, 1], [], []>} : vector<16x32xf32>, vector<32x16xf32>, vector<16x16xf32> -> vector<16x16xf32>
    %167 = vector.broadcast %159 : vector<1x16xf32> to vector<16x16xf32>
    %168 = arith.addf %166, %167 : vector<16x16xf32>
    %cst_84 = arith.constant 0.000000e+00 : f32
    %169 = vector.broadcast %cst_84 : f32 to vector<16x16xf32>
    %170 = arith.maximumf %168, %169 : vector<16x16xf32>
    %cst_85 = arith.constant dense<0.000000e+00> : vector<16x16xf32>
    %171 = tpu.matmul %3, %170, %cst_85 {dimension_numbers = #tpu.dot_dimension_numbers<[1], [0], [0], [1], [0, 0, 1, 1], [], []>} : vector<16x16xf32>, vector<16x16xf32>, vector<16x16xf32> -> vector<16x16xf32>
    %cst_86 = arith.constant dense<0.000000e+00> : vector<16x4xf32>
    %172 = tpu.matmul %171, %162, %cst_86 {dimension_numbers = #tpu.dot_dimension_numbers<[1], [0], [0], [1], [0, 0, 1, 1], [], []>} : vector<16x16xf32>, vector<16x4xf32>, vector<16x4xf32> -> vector<16x4xf32>
    %173 = vector.broadcast %165 : vector<1x4xf32> to vector<16x4xf32>
    %174 = arith.addf %172, %173 : vector<16x4xf32>
    %c0_87 = arith.constant 0 : index
    %c3 = arith.constant 3 : index
    %c0_88 = arith.constant 0 : index
    %c0_89 = arith.constant 0 : index
    %175 = vector.load %arg8[%c0_87, %c3, %c0_88, %c0_89] : memref<1x4x16x4xf32, #tpu.memory_space<vmem>>, vector<1x1x16x4xf32>
    %176 = vector.shape_cast %175 : vector<1x1x16x4xf32> to vector<16x4xf32>
    %177 = vector.shape_cast %174 : vector<16x4xf32> to vector<1x1x16x4xf32>
    tpu.vector_store %arg8[%c0_87, %c3, %c0_88, %c0_89], %177 {strides = array<i32>} : memref<1x4x16x4xf32, #tpu.memory_space<vmem>>, vector<1x1x16x4xf32>,
    return
  }
  func.func @transform_0(%arg0: i32) -> (i32, i32, i32) {
    %c0_i32 = arith.constant 0 : i32
    %c0_i32_0 = arith.constant 0 : i32
    %c0_i32_1 = arith.constant 0 : i32
    return %arg0, %c0_i32, %c0_i32_0 : i32, i32, i32
  }
  func.func @transform_1(%arg0: i32) -> (i32, i32, i32) {
    %c0_i32 = arith.constant 0 : i32
    %c0_i32_0 = arith.constant 0 : i32
    %c0_i32_1 = arith.constant 0 : i32
    return %arg0, %c0_i32, %c0_i32_0 : i32, i32, i32
  }
  func.func @transform_2(%arg0: i32) -> (i32, i32, i32) {
    %c0_i32 = arith.constant 0 : i32
    %c0_i32_0 = arith.constant 0 : i32
    %c0_i32_1 = arith.constant 0 : i32
    return %arg0, %c0_i32, %c0_i32_0 : i32, i32, i32
  }
  func.func @transform_3(%arg0: i32) -> (i32, i32) {
    %c0_i32 = arith.constant 0 : i32
    %c0_i32_0 = arith.constant 0 : i32
    %c0_i32_1 = arith.constant 0 : i32
    return %c0_i32, %c0_i32_0 : i32, i32
  }
  func.func @transform_4(%arg0: i32) -> (i32, i32) {
    %c0_i32 = arith.constant 0 : i32
    %c0_i32_0 = arith.constant 0 : i32
    %c0_i32_1 = arith.constant 0 : i32
    return %c0_i32, %c0_i32_0 : i32, i32
  }
  func.func @transform_5(%arg0: i32) -> (i32, i32) {
    %c0_i32 = arith.constant 0 : i32
    %c0_i32_0 = arith.constant 0 : i32
    %c0_i32_1 = arith.constant 0 : i32
    return %c0_i32, %c0_i32_0 : i32, i32
  }
  func.func @transform_6(%arg0: i32) -> (i32, i32) {
    %c0_i32 = arith.constant 0 : i32
    %c0_i32_0 = arith.constant 0 : i32
    %c0_i32_1 = arith.constant 0 : i32
    return %c0_i32, %c0_i32_0 : i32, i32
  }
  func.func @transform_7(%arg0: i32) -> (i32, i32, i32, i32) {
    %c0_i32 = arith.constant 0 : i32
    %c0_i32_0 = arith.constant 0 : i32
    %c0_i32_1 = arith.constant 0 : i32
    %c0_i32_2 = arith.constant 0 : i32
    return %arg0, %c0_i32, %c0_i32_0, %c0_i32_1 : i32, i32, i32, i32
  }
}

</mosaic_0001>

<bundles_post_ra>
// kernel: forward.1
= control target key start
LH: loop header
LB: loop body
LE: loop exit
PB: predicated region body
PF: predicated region fallthrough
CT: control target
= control target key end

     0   :  { %s1780_s24 = smov 0   ;;  %s2146_s0 = inlined_call_operand.vmem [shape: f32[2,16,32], index: 0, kind: input, shape index: {}]   ;;  %s2147_s1 = inlined_call_operand.vmem [shape: f32[2,16,16], index: 1, kind: input, shape index: {}]   ;;  %s2148_s2 = inlined_call_operand.vmem [shape: f32[2,16,4], index: 2, kind: input, shape index: {}]   ;;  %s2149_s3 = inlined_call_operand.vmem [shape: f32[32,16], index: 3, kind: input, shape index: {}]   ;;  %s2150_s4 = inlined_call_operand.vmem [shape: f32[1,16], index: 4, kind: input, shape index: {}]   ;;  %s2151_s5 = inlined_call_operand.vmem [shape: f32[16,4], index: 5, kind: input, shape index: {}]   ;;  %s2152_s6 = inlined_call_operand.vmem [shape: f32[1,4], index: 6, kind: input, shape index: {}]   ;;  %s2153_s7 = inlined_call_operand.vmem [shape: f32[2,4,16,4], index: 7, kind: output, shape index: {}]  }
   0x1 LB: > { %s1604_s25 = sadd.s32 4294967295, %s1738_s24   ;;  %p1608_p0 = scmp.ge.s32.totalorder %s1738_s24, 1  ;;  %s1738_s24 = sphi %s1780_s24, %s17_s24  }
   0x2   : > { %p257_p1 = scmp.lt.s32.totalorder %s1738_s24, 3 }
   0x4   : > { %p258_p2 = pnand %p1608_p0, %p257_p1 }
   0x5   : > { %p299_p3 = scmp.lt.s32.totalorder (!%p258_p2), %s1604_s25, 1 }
   0x6   : > { %261 = sbr.rel (%p258_p2) target bundleno = 3940 (0xf64), region = 48 }
   0xb   : > { %v1791_v0 = vld [vmem:[%s2149_s3 + $0x18] sm:$0xff]  ;;  %v1796_v1 = vld [vmem:[%s2149_s3 + $0x10] sm:$0xff]  ;;  %s2155_s25 = smov (!%p299_p3, %s1604_s25), 1  ;;  %v1804_v2 = vld [vmem:[%s2149_s3 + $0x8] sm:$0xff]  ;;  %vm342_vm0 = vcmask 130048   ;;  %vm375_vm1 = vcmask 261120  }
   0xc   : > { %394 = vmatpush.msra.mxu1 %v1791_v0  ;;  %s1808_s9 = sshll.u32 %s2155_s25, 4  ;;  %v1832_v7 = vld [vmem:[%s2149_s3] sm:$0xff]  ;;  %v1846_v10 = vld [vmem:[%s2151_s5 + $0x8] sm:$0xff]  ;;  %vm462_vm2 = vcmask 31744   ;;  %s1696_s26 = sshll.u32 %s2155_s25, 6 }
   0xd   : > { %s303_s12 = scalar_lea.vmem %s2146_s0, %s1808_s9  ;;  %s308_s15 = scalar_lea.vmem %s2147_s1, %s1808_s9  ;;  %453 = vmatpush.msra.mxu3 %v1846_v10  ;;  %v1706_v12 = vld [vmem:[%s2150_s4] ss:$0 sm:$0xff] }
   0xe   : > { %395 = vmatpush.msra.mxu1 %v1796_v1  ;;  %v320_v3 = vld [vmem:[%s303_s12 + $0x8] sm:$0xff]  ;;  %v1819_v4 = vld [vmem:[%s308_s15] sm:$0xff]  ;;  %s1881_s8 = scalar_lea.vmem %s2153_s7, %s1696_s26  ;;  %s313_s11 = scalar_lea.vmem %s2148_s2, %s1808_s9 }
   0xf   : > { %363 = vmatpush.msra.mxu0 %v320_v3  ;;  %v319_v5 = vld [vmem:[%s303_s12] sm:$0xff]  ;;  %589 = vxpose.xlu2.b32.start [1/2] (short) (narrow) %v1819_v4, 16  ;;  %v1824_v6 = vld [vmem:[%s308_s15 + $0x8] sm:$0xff] }
  0x10   : > { %396 = vmatpush.msra.mxu1 %v1804_v2  ;;  %v1865_v18 = vld [vmem:[%s2151_s5] sm:$0xff]  ;;  %v1897_v51 = vld [vmem:[%s313_s11 + $0x8] sm:$0xff] }
  0x11   : > { %364 = vmatpush.msra.mxu0 %v319_v5  ;;  %454 = vmatpush.msra.mxu3 %v1865_v18  ;;  %v1707_v21 = vld [vmem:[%s2152_s6] ss:$0 sm:$0xff] }
  0x12   : > { %1617 = vmatmul.msk.f32.vlgmr.msra.gmra.mxu0 %vm342_vm0, %v1819_v4  ;;  %397 = vmatpush.msra.mxu1 %v1832_v7  ;;  %v1900_v3 = vld [vmem:[%s313_s11] sm:$0xff] }
  0x13   : > { %1629 = vmatpush.xpose.msk.msrb.mxu3 %vm462_vm2, %v1846_v10 }
  0x17   : > { %590 = vxpose.xlu2.b32.end [2/2] (short) (narrow) %v1824_v6, 16  ;;  %1630 = vmatpush.xpose.msk.msrb.mxu3 %vm462_vm2, %v1865_v18 }
  0x1a   : > { %1618 = vmatmul.msk.f32.gmra.mxu0 %vm342_vm0, %v1824_v6 }
  0x8f   : > { %v1835_v8 = vpop.f32.mrf.mxu0 }
  0x90   : > { %1619 = vmatmul.msk.f32.vlgmr.msra.gmra.mxu1 %vm375_vm1, %v1835_v8 }
  0x97   : > { %v1839_v9 = vpop.f32.mrf.mxu0 }
  0x98   : > { %1620 = vmatmul.msk.f32.gmra.mxu1 %vm375_vm1, %v1839_v9 }
 0x10d   : > { %v399_v11 = vpop.f32.mrf.mxu1 }
 0x10e   : > { %v1852_v14 = vadd.f32 %v1706_v12, %v399_v11 }
 0x110   : > { %v405_v17 = vmax.f32 %v1852_v14, 0.0  ;;  %vm685_vm11 = vcmp.gt.f32.partialorder %v1852_v14, 0.0 }
 0x115   : > { %v402_v13 = vpop.f32.mrf.mxu1 }
 0x116   : > { %v1854_v15 = vadd.f32 %v1706_v12, %v402_v13  ;;  %v1902_v12 = vpop.trf.xlu2 }
 0x118   : > { %v406_v16 = vmax.f32 %v1854_v15, 0.0  ;;  %vm686_vm12 = vcmp.gt.f32.partialorder %v1854_v15, 0.0 }
 0x11a   : > { %421 = vmatpush.msra.mxu2 %v406_v16 }
 0x11c   : > { %422 = vmatpush.msra.mxu2 %v405_v17 }
 0x11d   : > { %1621 = vmatmul.msk.f32.vlgmr.msra.gmra.mxu2 %vm342_vm0, %v1819_v4 }
 0x125   : > { %1622 = vmatmul.msk.f32.gmra.mxu2 %vm342_vm0, %v1824_v6 }
 0x1a0   : > { %v424_v19 = vpop.f32.mrf.mxu2 }
 0x1a1   : > { %1623 = vmatmul.msk.f32.vlgmr.msra.gmra.mxu3 %vm342_vm0, %v424_v19 }
 0x1a8   : > { %v427_v20 = vpop.f32.mrf.mxu2 }
 0x1a9   : > { %1624 = vmatmul.msk.f32.gmra.mxu3 %vm342_vm0, %v427_v20 }
 0x224   : > { %v456_v22 = vpop.f32.mrf.mxu3 }
 0x225   : > { %v457_v23 = vadd.f32 %v1707_v21, %v456_v22 }
 0x227   : > { %463 = vst.msk [vmem:[%s1881_s8] sm:$0xff] %vm462_vm2, %v457_v23  ;;  %v465_v27 = vsel %vm462_vm2, %v457_v23, -inf }
 0x22c   : > { %v459_v24 = vpop.f32.mrf.mxu3 }
 0x22d   : > { %v460_v25 = vadd.f32 %v1707_v21, %v459_v24  ;;  %v1911_v21 = vpop.trf.xlu2 }
 0x22f   : > { %464 = vst.msk [vmem:[%s1881_s8 + $0x8] sm:$0xff] %vm462_vm2, %v460_v25  ;;  %v468_v26 = vsel %vm462_vm2, %v460_v25, -inf }
 0x230   : > { %469 = vmax.xlane.f32.xlu0 %v468_v26 }
 0x238   : > { %466 = vmax.xlane.f32.xlu0 %v465_v27 }
 0x261   : > { %689 = vxpose.xlu0.b32.start [1/2] (short) (narrow) %v1835_v8, 32 }
 0x269   : > { %690 = vxpose.xlu0.b32.end [2/2] (short) (narrow) %v1839_v9, 32 }
 0x2a3   : > { %v470_v28 = vpop.xlane.xlu0 %469 }
 0x2a4   : > { %v472_v29 = vsub.f32 %v460_v25, %v470_v28 }
 0x2a6   : > { %v475_v30 = vmul.f32 1.442695, %v472_v29 }
 0x2a8   : > { %1708 = vpow2.f32 %v475_v30 }
 0x2ab   : > { %v467_v31 = vpop.xlane.xlu0 %466 }
 0x2ac   : > { %v471_v32 = vsub.f32 %v457_v23, %v467_v31 }
 0x2ae   : > { %v1709_v33 = vpop.eup %1708  ;;  %v473_v34 = vmul.f32 1.442695, %v471_v32 }
 0x2af   : > { %v480_v35 = vsel %vm462_vm2, %v1709_v33, 0.0 }
 0x2b0   : > { %1710 = vpow2.f32 %v473_v34  ;;  %481 = vadd.xlane.f32.xlu1 %v480_v35 }
 0x2b6   : > { %v1711_v36 = vpop.eup %1710 }
 0x2b7   : > { %v477_v37 = vsel %vm462_vm2, %v1711_v36, 0.0 }
 0x2b8   : > { %478 = vadd.xlane.f32.xlu1 %v477_v37 }
 0x2f2   : > { %519 = vxpose.xlu1.b32.start [1/2] (short) (narrow) %v424_v19, 16 }
 0x2fa   : > { %520 = vxpose.xlu1.b32.end [2/2] (short) (narrow) %v427_v20, 16 }
 0x305   : > { %v1918_v26 = vpop.trf.xlu0 }
 0x30d   : > { %v1925_v32 = vpop.trf.xlu0 }
 0x315   : > { %v1929_v14 = vpop.trf.xlu0 }
 0x31d   : > { %v1933_v15 = vpop.trf.xlu0 }
 0x323   : > { %v482_v38 = vpop.xlane.xlu1 %481 }
 0x324   : > { %1712 = vrcp.f32 %v482_v38  ;;  %v509_v43 = vand.u32 2147483648, %v482_v38  ;;  %v507_v45 = vand.u32 2147483647, %v482_v38  ;;  %vm503_vm4 = vweird.f32 %v482_v38 }
 0x326   : > { %v510_v48 = vor.u32 1.1754944e-38, %v509_v43  ;;  %vm508_vm6 = vcmp.eq.f32.partialorder %v507_v45, 8.507059e+37 }
 0x32a   : > { %v1713_v39 = vpop.eup %1712 }
 0x32b   : > { %v499_v40 = vmul.f32 %v1713_v39, %v482_v38  ;;  %v479_v41 = vpop.xlane.xlu1 %478  ;;  %vm504_vm3 = vweird.f32 %v1713_v39 }
 0x32c   : > { %1714 = vrcp.f32 %v479_v41  ;;  %vm505_vm5 = vmor %vm503_vm4, %vm504_vm3  ;;  %v494_v55 = vand.u32 2147483648, %v479_v41  ;;  %v492_v57 = vand.u32 2147483647, %v479_v41  ;;  %vm488_vm8 = vweird.f32 %v479_v41 }
 0x32d   : > { %v500_v42 = vsub.f32 1.0, %v499_v40 }
 0x32e   : > { %v495_v61 = vor.u32 1.1754944e-38, %v494_v55  ;;  %vm493_vm10 = vcmp.eq.f32.partialorder %v492_v57, 8.507059e+37 }
 0x32f   : > { %v501_v44 = vmul.f32 %v1713_v39, %v500_v42 }
 0x331   : > { %v502_v46 = vadd.f32 %v1713_v39, %v501_v44 }
 0x332   : > { %v1715_v47 = vpop.eup %1714 }
 0x333   : > { %v484_v49 = vmul.f32 %v1715_v47, %v479_v41  ;;  %v506_v50 = vsel %vm505_vm5, %v1713_v39, %v502_v46  ;;  %vm489_vm7 = vweird.f32 %v1715_v47 }
 0x334   : > { %v511_v52 = vsel %vm508_vm6, %v510_v48, %v506_v50  ;;  %vm490_vm9 = vmor %vm488_vm8, %vm489_vm7 }
 0x335   : > { %v485_v53 = vsub.f32 1.0, %v484_v49  ;;  %v512_v54 = vmul.f32 %v1709_v33, %v511_v52 }
 0x337   : > { %v486_v56 = vmul.f32 %v1715_v47, %v485_v53  ;;  %v514_v58 = vsub.f32 %v512_v54, %v1897_v51 }
 0x339   : > { %v487_v59 = vadd.f32 %v1715_v47, %v486_v56  ;;  %v516_v60 = vmul.f32 0.0, %v514_v58 }
 0x33b   : > { %v518_v62 = vmul.f32 0.125, %v516_v60  ;;  %v491_v63 = vsel %vm490_vm9, %v1715_v47, %v487_v59 }
 0x33c   : > { %v496_v5 = vsel %vm493_vm10, %v495_v61, %v491_v63 }
 0x33d   : > { %571 = vmatpush.msrb.mxu0 %v518_v62  ;;  %641 = vmatpush.msrb.mxu2 %v518_v62  ;;  %v497_v11 = vmul.f32 %v1711_v36, %v496_v5  ;;  %v581_v17 = vsel %vm462_vm2, %v518_v62, 0.0 }
 0x33f   : > { %v513_v13 = vsub.f32 %v497_v11, %v1900_v3 }
 0x341   : > { %v517_v16 = vmul.f32 0.125, %v513_v13 }
 0x343   : > { %572 = vmatpush.msrb.mxu0 %v517_v16  ;;  %v580_v19 = vsel %vm462_vm2, %v517_v16, 0.0  ;;  %642 = vmatpush.msrb.mxu2 %v517_v16 }
 0x344   : > { %v1907_v20 = vadd.f32 %v581_v17, %v580_v19  ;;  %1627 = vmatmul.msk.f32.vlgmr.msrb.gmra.mxu2 %vm342_vm0, %v1902_v12 }
 0x346   : > { %v583_v13 = vrot.slane %v1907_v20, 4 }
 0x348   : > { %v584_v16 = vadd.f32 %v583_v13, %v1907_v20 }
 0x34a   : > { %v585_v17 = vrot.slane %v584_v16, 2 }
 0x34c   : > { %1628 = vmatmul.msk.f32.gmra.mxu2 %vm342_vm0, %v1911_v21  ;;  %v586_v19 = vadd.f32 %v585_v17, %v584_v16 }
 0x396   : > { %v535_v33 = vpop.trf.xlu1 }
 0x397   : > { %1625 = vmatmul.msk.f32.vlgmr.msrb.gmra.mxu0 %vm342_vm0, %v535_v33 }
 0x39e   : > { %v536_v34 = vpop.trf.xlu1 }
 0x39f   : > { %1626 = vmatmul.msk.f32.gmra.mxu0 %vm342_vm0, %v536_v34 }
 0x3c7   : > { %v644_v22 = vpop.f32.mrf.mxu2 }
 0x3c8   : > { %1631 = vmatmul.msk.f32.vlgmr.msrb.gmra.mxu3 %vm462_vm2, %v644_v22  ;;  %v587_v22 = vrot.slane %v586_v19, 1 }
 0x3cf   : > { %v647_v23 = vpop.f32.mrf.mxu2 }
 0x3d0   : > { %1632 = vmatmul.msk.f32.gmra.mxu3 %vm462_vm2, %v647_v23  ;;  %v588_v23 = vadd.f32 %v587_v22, %v586_v19 }
 0x44b   : > { %v679_v24 = vpop.f32.mrf.mxu3 }
 0x44c   : > { %v687_v25 = vsel %vm685_vm11, %v679_v24, 0.0 }
 0x44d   : > { %v762_v29 = vsel %vm342_vm0, %v687_v25, 0.0  ;;  %v332_v25 = vld [vmem:[%s2152_s6] sm:$0x1] }
 0x453   : > { %v682_v27 = vpop.f32.mrf.mxu3 }
 0x454   : > { %v688_v28 = vsel %vm686_vm12, %v682_v27, 0.0  ;;  %1633 = vmatpush.msk.msrb.mxu1 %vm686_vm12, %v682_v27 }
 0x455   : > { %v763_v30 = vsel %vm342_vm0, %v688_v28, 0.0 }
 0x456   : > { %v764_v31 = vadd.f32 %v763_v30, %v762_v29  ;;  %1634 = vmatpush.msk.msrb.mxu1 %vm685_vm11, %v679_v24  ;;  %v785_v24 = vmul.f32 0.05, %v588_v23 }
 0x457   : > { %1635 = vmatmul.msk.f32.vlgmr.msrb.gmra.mxu1 %vm342_vm0, %v1918_v26 }
 0x458   : > { %v765_v49 = vrot.slane %v764_v31, 4  ;;  %v1994_v27 = vsub.f32 %v332_v25, %v785_v24 }
 0x45a   : > { %v766_v50 = vadd.f32 %v765_v49, %v764_v31  ;;  %v839_v28 = vperm.slane %v1994_v27, 0 }
 0x45c   : > { %v767_v52 = vrot.slane %v766_v50, 2 }
 0x45e   : > { %v768_v53 = vadd.f32 %v767_v52, %v766_v50 }
 0x45f   : > { %1636 = vmatmul.msk.f32.gmra.mxu1 %vm342_vm0, %v1925_v32 }
 0x460   : > { %v769_v54 = vrot.slane %v768_v53, 1 }
 0x467   : > { %1637 = vmatmul.msk.f32.gmra.mxu1 %vm342_vm0, %v1929_v14 }
 0x46f   : > { %1638 = vmatmul.msk.f32.gmra.mxu1 %vm342_vm0, %v1933_v15 }
 0x4d4   : > { %v750_v35 = vpop.f32.mrf.mxu1 }
 0x4d5   : > { %v771_v43 = vmul.f32 0.05, %v750_v35 }
 0x4d7   : > { %v1951_v46 = vsub.f32 %v1832_v7, %v771_v43 }
 0x4dc   : > { %v753_v36 = vpop.f32.mrf.mxu1 }
 0x4dd   : > { %v772_v41 = vmul.f32 0.05, %v753_v36 }
 0x4df   : > { %v1947_v45 = vsub.f32 %v1804_v2, %v772_v41 }
 0x4e4   : > { %v756_v37 = vpop.f32.mrf.mxu1 }
 0x4e5   : > { %v773_v39 = vmul.f32 0.05, %v756_v37 }
 0x4e7   : > { %v1943_v44 = vsub.f32 %v1796_v1, %v773_v39 }
 0x4ec   : > { %v759_v38 = vpop.f32.mrf.mxu1 }
 0x4ed   : > { %v774_v40 = vmul.f32 0.05, %v759_v38 }
 0x4ef   : > { %v1940_v42 = vsub.f32 %v1791_v0, %v774_v40  ;;  %v574_v0 = vpop.f32.mrf.mxu0 }
 0x4f0   : > { %v781_v1 = vmul.f32 0.05, %v574_v0 }
 0x4f1   : > { %802 = vmatpush.msra.mxu0 %v1940_v42 }
 0x4f2   : > { %v1960_v48 = vsub.f32 %v1865_v18, %v781_v1  ;;  %v770_v18 = vadd.f32 %v769_v54, %v768_v53 }
 0x4f3   : > { %803 = vmatpush.msra.mxu0 %v1943_v44 }
 0x4f4   : > { %v779_v55 = vmul.f32 0.05, %v770_v18 }
 0x4f5   : > { %804 = vmatpush.msra.mxu0 %v1947_v45 }
 0x4f7   : > { %805 = vmatpush.msra.mxu0 %v1951_v46  ;;  %v577_v47 = vpop.f32.mrf.mxu0 }
 0x4f8   : > { %1639 = vmatmul.msk.f32.vlgmr.msra.gmra.mxu0 %vm375_vm1, %v1835_v8  ;;  %v782_v2 = vmul.f32 0.05, %v577_v47 }
 0x4fa   : > { %v1963_v7 = vsub.f32 %v1846_v10, %v782_v2  ;;  %v329_v10 = vld [vmem:[%s2150_s4] sm:$0x1] }
 0x4fb   : > { %v1974_v57 = vsub.f32 %v329_v10, %v779_v55 }
 0x4fc   : > { %861 = vmatpush.msra.mxu3 %v1963_v7 }
 0x4fd   : > { %v788_v58 = vperm.slane %v1974_v57, 0 }
 0x4fe   : > { %862 = vmatpush.msra.mxu3 %v1960_v48 }
 0x500   : > { %1640 = vmatmul.msk.f32.gmra.mxu0 %vm375_vm1, %v1839_v9  ;;  %1651 = vmatpush.xpose.msk.msrb.mxu3 %vm462_vm2, %v1963_v7 }
 0x504   : > { %1652 = vmatpush.xpose.msk.msrb.mxu3 %vm462_vm2, %v1960_v48 }
 0x575   : > { %v807_v56 = vpop.f32.mrf.mxu0 }
 0x576   : > { %v1977_v60 = vadd.f32 %v807_v56, %v788_v58 }
 0x578   : > { %v813_v63 = vmax.f32 %v1977_v60, 0.0  ;;  %vm1055_vm8 = vcmp.gt.f32.partialorder %v1977_v60, 0.0 }
 0x57d   : > { %v810_v59 = vpop.f32.mrf.mxu0 }
 0x57e   : > { %v1979_v61 = vadd.f32 %v810_v59, %v788_v58 }
 0x580   : > { %v814_v62 = vmax.f32 %v1979_v61, 0.0  ;;  %vm1056_vm9 = vcmp.gt.f32.partialorder %v1979_v61, 0.0 }
 0x582   : > { %829 = vmatpush.msra.mxu2 %v814_v62 }
 0x584   : > { %830 = vmatpush.msra.mxu2 %v813_v63 }
 0x585   : > { %1641 = vmatmul.msk.f32.vlgmr.msra.gmra.mxu2 %vm342_vm0, %v1819_v4 }
 0x58d   : > { %1642 = vmatmul.msk.f32.gmra.mxu2 %vm342_vm0, %v1824_v6 }
 0x608   : > { %v832_v5 = vpop.f32.mrf.mxu2 }
 0x609   : > { %1643 = vmatmul.msk.f32.vlgmr.msra.gmra.mxu3 %vm342_vm0, %v832_v5 }
 0x610   : > { %v835_v11 = vpop.f32.mrf.mxu2 }
 0x611   : > { %1644 = vmatmul.msk.f32.gmra.mxu3 %vm342_vm0, %v835_v11 }
 0x68c   : > { %v864_v29 = vpop.f32.mrf.mxu3 }
 0x68d   : > { %v865_v30 = vadd.f32 %v864_v29, %v839_v28 }
 0x68f   : > { %1645 = vst.msk [vmem:[%s1881_s8 + $0x10] sm:$0xff] %vm462_vm2, %v865_v30  ;;  %v873_v20 = vsel %vm462_vm2, %v865_v30, -inf }
 0x690   : > { %874 = vmax.xlane.f32.xlu0 %v873_v20 }
 0x694   : > { %v867_v31 = vpop.f32.mrf.mxu3 }
 0x695   : > { %v868_v33 = vadd.f32 %v867_v31, %v839_v28 }
 0x697   : > { %1646 = vst.msk [vmem:[%s1881_s8 + $0x18] sm:$0xff] %vm462_vm2, %v868_v33  ;;  %v876_v34 = vsel %vm462_vm2, %v868_v33, -inf }
 0x698   : > { %877 = vmax.xlane.f32.xlu2 %v876_v34 }
 0x703   : > { %v875_v35 = vpop.xlane.xlu0 %874 }
 0x704   : > { %v879_v36 = vsub.f32 %v865_v30, %v875_v35 }
 0x706   : > { %v881_v37 = vmul.f32 1.442695, %v879_v36 }
 0x708   : > { %1716 = vpow2.f32 %v881_v37 }
 0x70b   : > { %v878_v38 = vpop.xlane.xlu2 %877 }
 0x70c   : > { %v880_v39 = vsub.f32 %v868_v33, %v878_v38 }
 0x70e   : > { %v1717_v40 = vpop.eup %1716  ;;  %v883_v41 = vmul.f32 1.442695, %v880_v39 }
 0x70f   : > { %v885_v43 = vsel %vm462_vm2, %v1717_v40, 0.0 }
 0x710   : > { %1718 = vpow2.f32 %v883_v41  ;;  %886 = vadd.xlane.f32.xlu2 %v885_v43 }
 0x716   : > { %v1719_v0 = vpop.eup %1718 }
 0x717   : > { %v888_v1 = vsel %vm462_vm2, %v1719_v0, 0.0 }
 0x718   : > { %889 = vadd.xlane.f32.xlu1 %v888_v1 }
 0x739   : > { %927 = vxpose.xlu2.b32.start [1/2] (short) (narrow) %v832_v5, 16 }
 0x741   : > { %928 = vxpose.xlu2.b32.end [2/2] (short) (narrow) %v835_v11, 16 }
 0x783   : > { %v887_v47 = vpop.xlane.xlu2 %886 }
 0x784   : > { %1720 = vrcp.f32 %v887_v47  ;;  %v902_v54 = vand.u32 2147483648, %v887_v47  ;;  %vm896_vm14 = vweird.f32 %v887_v47  ;;  %v900_v55 = vand.u32 2147483647, %v887_v47 }
 0x786   : > { %v903_v59 = vor.u32 1.1754944e-38, %v902_v54  ;;  %vm901_vm3 = vcmp.eq.f32.partialorder %v900_v55, 8.507059e+37 }
 0x78a   : > { %v1721_v2 = vpop.eup %1720 }
 0x78b   : > { %v892_v49 = vmul.f32 %v1721_v2, %v887_v47  ;;  %v890_v50 = vpop.xlane.xlu1 %889  ;;  %vm897_vm13 = vweird.f32 %v1721_v2 }
 0x78c   : > { %1722 = vrcp.f32 %v890_v50  ;;  %vm898_vm15 = vmor %vm896_vm14, %vm897_vm13  ;;  %v917_v63 = vand.u32 2147483648, %v890_v50  ;;  %v915_v13 = vand.u32 2147483647, %v890_v50  ;;  %vm911_vm5 = vweird.f32 %v890_v50 }
 0x78d   : > { %v893_v52 = vsub.f32 1.0, %v892_v49 }
 0x78e   : > { %v918_v19 = vor.u32 1.1754944e-38, %v917_v63  ;;  %vm916_vm7 = vcmp.eq.f32.partialorder %v915_v13, 8.507059e+37 }
 0x78f   : > { %v894_v53 = vmul.f32 %v1721_v2, %v893_v52 }
 0x791   : > { %v895_v18 = vadd.f32 %v1721_v2, %v894_v53 }
 0x792   : > { %v1723_v10 = vpop.eup %1722 }
 0x793   : > { %v907_v56 = vmul.f32 %v1723_v10, %v890_v50  ;;  %v899_v58 = vsel %vm898_vm15, %v1721_v2, %v895_v18  ;;  %vm912_vm4 = vweird.f32 %v1723_v10 }
 0x794   : > { %v904_v5 = vsel %vm901_vm3, %v903_v59, %v899_v58  ;;  %vm913_vm6 = vmor %vm911_vm5, %vm912_vm4 }
 0x795   : > { %v908_v62 = vsub.f32 1.0, %v907_v56  ;;  %v905_v17 = vmul.f32 %v1717_v40, %v904_v5 }
 0x797   : > { %v909_v11 = vmul.f32 %v1723_v10, %v908_v62  ;;  %v921_v25 = vsub.f32 %v905_v17, %v1900_v3 }
 0x799   : > { %v910_v16 = vadd.f32 %v1723_v10, %v909_v11  ;;  %v925_v30 = vmul.f32 0.125, %v921_v25 }
 0x79b   : > { %v914_v22 = vsel %vm913_vm6, %v1723_v10, %v910_v16  ;;  %v988_v31 = vsel %vm462_vm2, %v925_v30, 0.0 }
 0x79c   : > { %v919_v23 = vsel %vm916_vm7, %v918_v19, %v914_v22 }
 0x79d   : > { %v920_v24 = vmul.f32 %v1719_v0, %v919_v23 }
 0x79f   : > { %v922_v28 = vsub.f32 %v920_v24, %v1897_v51 }
 0x7a1   : > { %v924_v29 = vmul.f32 0.0, %v922_v28 }
 0x7a3   : > { %v926_v20 = vmul.f32 0.125, %v924_v29 }
 0x7a5   : > { %979 = vmatpush.msrb.mxu0 %v926_v20  ;;  %1011 = vmatpush.msrb.mxu2 %v926_v20  ;;  %v989_v33 = vsel %vm462_vm2, %v926_v20, 0.0 }
 0x7a6   : > { %v2009_v34 = vadd.f32 %v989_v33, %v988_v31 }
 0x7a7   : > { %980 = vmatpush.msrb.mxu0 %v925_v30  ;;  %1012 = vmatpush.msrb.mxu2 %v925_v30 }
 0x7a8   : > { %1649 = vmatmul.msk.f32.vlgmr.msrb.gmra.mxu2 %vm342_vm0, %v1902_v12  ;;  %v991_v30 = vrot.slane %v2009_v34, 4 }
 0x7aa   : > { %v992_v20 = vadd.f32 %v991_v30, %v2009_v34 }
 0x7ac   : > { %v993_v31 = vrot.slane %v992_v20, 2 }
 0x7ae   : > { %v994_v33 = vadd.f32 %v993_v31, %v992_v20 }
 0x7b0   : > { %1650 = vmatmul.msk.f32.gmra.mxu2 %vm342_vm0, %v1911_v21 }
 0x7d2   : > { %v943_v35 = vpop.trf.xlu2 }
 0x7d3   : > { %1647 = vmatmul.msk.f32.vlgmr.msrb.gmra.mxu0 %vm342_vm0, %v943_v35  ;;  %v995_v35 = vrot.slane %v994_v33, 1 }
 0x7da   : > { %v944_v36 = vpop.trf.xlu2 }
 0x7db   : > { %1648 = vmatmul.msk.f32.gmra.mxu0 %vm342_vm0, %v944_v36  ;;  %v996_v36 = vadd.f32 %v995_v35, %v994_v33 }
 0x82b   : > { %v1014_v37 = vpop.f32.mrf.mxu2 }
 0x82c   : > { %1653 = vmatmul.msk.f32.vlgmr.msrb.gmra.mxu3 %vm462_vm2, %v1014_v37  ;;  %v1111_v37 = vmul.f32 0.05, %v996_v36 }
 0x833   : > { %v1017_v38 = vpop.f32.mrf.mxu2 }
 0x834   : > { %1654 = vmatmul.msk.f32.gmra.mxu3 %vm462_vm2, %v1017_v38  ;;  %v2082_v38 = vsub.f32 %v1994_v27, %v1111_v37 }
 0x850   : > { %v982_v39 = vpop.f32.mrf.mxu0 }
 0x851   : > { %v1107_v41 = vmul.f32 0.05, %v982_v39  ;;  %v1165_v39 = vperm.slane %v2082_v38, 0 }
 0x853   : > { %v2023_v1 = vsub.f32 %v1960_v48, %v1107_v41 }
 0x858   : > { %v985_v40 = vpop.f32.mrf.mxu0 }
 0x859   : > { %v1108_v43 = vmul.f32 0.05, %v985_v40 }
 0x85b   : > { %v2020_v0 = vsub.f32 %v1963_v7, %v1108_v43 }
 0x85d   : > { %1187 = vmatpush.msra.mxu3 %v2020_v0 }
 0x85f   : > { %1188 = vmatpush.msra.mxu3 %v2023_v1 }
 0x861   : > { %1673 = vmatpush.xpose.msk.msrb.mxu3 %vm462_vm2, %v2020_v0 }
 0x865   : > { %1674 = vmatpush.xpose.msk.msrb.mxu3 %vm462_vm2, %v2023_v1 }
 0x8af   : > { %v1049_v47 = vpop.f32.mrf.mxu3 }
 0x8b0   : > { %v1057_v2 = vsel %vm1055_vm8, %v1049_v47, 0.0 }
 0x8b1   : > { %v1088_v48 = vsel %vm342_vm0, %v1057_v2, 0.0 }
 0x8b7   : > { %v1052_v7 = vpop.f32.mrf.mxu3 }
 0x8b8   : > { %v1058_v49 = vsel %vm1056_vm9, %v1052_v7, 0.0  ;;  %1655 = vmatpush.msk.msra.mxu1 %vm1056_vm9, %v1052_v7 }
 0x8b9   : > { %v1089_v50 = vsel %vm342_vm0, %v1058_v49, 0.0 }
 0x8ba   : > { %v1090_v52 = vadd.f32 %v1089_v50, %v1088_v48  ;;  %1656 = vmatpush.msk.msra.mxu1 %vm1055_vm8, %v1049_v47 }
 0x8bb   : > { %1657 = vmatmul.msk.f32.vlgmr.msra.gmra.mxu1 %vm342_vm0, %v1918_v26 }
 0x8c3   : > { %1658 = vmatmul.msk.f32.gmra.mxu1 %vm342_vm0, %v1925_v32 }
 0x8cb   : > { %1659 = vmatmul.msk.f32.gmra.mxu1 %vm342_vm0, %v1929_v14 }
 0x8d3   : > { %1660 = vmatmul.msk.f32.gmra.mxu1 %vm342_vm0, %v1933_v15 }
 0x938   : > { %v1076_v60 = vpop.f32.mrf.mxu1 }
 0x939   : > { %v1097_v58 = vmul.f32 0.05, %v1076_v60 }
 0x93b   : > { %v2055_v63 = vsub.f32 %v1951_v46, %v1097_v58 }
 0x940   : > { %v1079_v61 = vpop.f32.mrf.mxu1 }
 0x941   : > { %v1098_v10 = vmul.f32 0.05, %v1079_v61 }
 0x943   : > { %v2051_v62 = vsub.f32 %v1947_v45, %v1098_v10 }
 0x948   : > { %v1082_v53 = vpop.f32.mrf.mxu1 }
 0x949   : > { %v1099_v18 = vmul.f32 0.05, %v1082_v53 }
 0x94b   : > { %v2047_v59 = vsub.f32 %v1943_v44, %v1099_v18 }
 0x950   : > { %v1085_v54 = vpop.f32.mrf.mxu1 }
 0x951   : > { %v1100_v55 = vmul.f32 0.05, %v1085_v54 }
 0x953   : > { %v2044_v56 = vsub.f32 %v1940_v42, %v1100_v55  ;;  %v1091_v42 = vrot.slane %v1090_v52, 4 }
 0x955   : > { %1128 = vmatpush.msra.mxu0 %v2044_v56  ;;  %v1092_v44 = vadd.f32 %v1091_v42, %v1090_v52 }
 0x957   : > { %1129 = vmatpush.msra.mxu0 %v2047_v59  ;;  %v1093_v5 = vrot.slane %v1092_v44, 2 }
 0x959   : > { %1130 = vmatpush.msra.mxu0 %v2051_v62  ;;  %v1094_v45 = vadd.f32 %v1093_v5, %v1092_v44 }
 0x95b   : > { %1131 = vmatpush.msra.mxu0 %v2055_v63  ;;  %v1095_v11 = vrot.slane %v1094_v45, 1 }
 0x95c   : > { %1661 = vmatmul.msk.f32.vlgmr.msra.gmra.mxu0 %vm375_vm1, %v1835_v8 }
 0x95d   : > { %v1096_v13 = vadd.f32 %v1095_v11, %v1094_v45 }
 0x95f   : > { %v1105_v16 = vmul.f32 0.05, %v1096_v13 }
 0x961   : > { %v2064_v46 = vsub.f32 %v1974_v57, %v1105_v16 }
 0x963   : > { %v1114_v19 = vperm.slane %v2064_v46, 0 }
 0x964   : > { %1662 = vmatmul.msk.f32.gmra.mxu0 %vm375_vm1, %v1839_v9 }
 0x9d9   : > { %v1133_v17 = vpop.f32.mrf.mxu0 }
 0x9da   : > { %v2067_v23 = vadd.f32 %v1133_v17, %v1114_v19 }
 0x9dc   : > { %v1139_v28 = vmax.f32 %v2067_v23, 0.0  ;;  %vm1381_vm5 = vcmp.gt.f32.partialorder %v2067_v23, 0.0 }
 0x9e1   : > { %v1136_v22 = vpop.f32.mrf.mxu0 }
 0x9e2   : > { %v2069_v24 = vadd.f32 %v1136_v22, %v1114_v19 }
 0x9e4   : > { %v1140_v25 = vmax.f32 %v2069_v24, 0.0  ;;  %vm1382_vm6 = vcmp.gt.f32.partialorder %v2069_v24, 0.0 }
 0x9e6   : > { %1155 = vmatpush.msra.mxu2 %v1140_v25 }
 0x9e8   : > { %1156 = vmatpush.msra.mxu2 %v1139_v28 }
 0x9e9   : > { %1663 = vmatmul.msk.f32.vlgmr.msra.gmra.mxu2 %vm342_vm0, %v1819_v4 }
 0x9f1   : > { %1664 = vmatmul.msk.f32.gmra.mxu2 %vm342_vm0, %v1824_v6 }
 0xa6c   : > { %v1158_v57 = vpop.f32.mrf.mxu2 }
 0xa6d   : > { %1665 = vmatmul.msk.f32.vlgmr.msra.gmra.mxu3 %vm342_vm0, %v1158_v57 }
 0xa74   : > { %v1161_v29 = vpop.f32.mrf.mxu2 }
 0xa75   : > { %1666 = vmatmul.msk.f32.gmra.mxu3 %vm342_vm0, %v1161_v29 }
 0xaf0   : > { %v1190_v40 = vpop.f32.mrf.mxu3 }
 0xaf1   : > { %v1191_v41 = vadd.f32 %v1190_v40, %v1165_v39 }
 0xaf3   : > { %1667 = vst.msk [vmem:[%s1881_s8 + $0x20] sm:$0xff] %vm462_vm2, %v1191_v41  ;;  %v1199_v2 = vsel %vm462_vm2, %v1191_v41, -inf }
 0xaf8   : > { %v1193_v43 = vpop.f32.mrf.mxu3 }
 0xaf9   : > { %v1194_v47 = vadd.f32 %v1193_v43, %v1165_v39 }
 0xafb   : > { %1668 = vst.msk [vmem:[%s1881_s8 + $0x28] sm:$0xff] %vm462_vm2, %v1194_v47  ;;  %v1202_v34 = vsel %vm462_vm2, %v1194_v47, -inf }
 0xafc   : > { %1203 = vmax.xlane.f32.xlu1 %v1202_v34 }
 0xb04   : > { %1200 = vmax.xlane.f32.xlu1 %v1199_v2 }
 0xb3e   : > { %1253 = vxpose.xlu1.b32.start [1/2] (short) (narrow) %v1158_v57, 16 }
 0xb46   : > { %1254 = vxpose.xlu1.b32.end [2/2] (short) (narrow) %v1161_v29, 16 }
 0xb6f   : > { %v1204_v27 = vpop.xlane.xlu1 %1203 }
 0xb70   : > { %v1206_v7 = vsub.f32 %v1194_v47, %v1204_v27 }
 0xb72   : > { %v1209_v49 = vmul.f32 1.442695, %v1206_v7 }
 0xb74   : > { %1724 = vpow2.f32 %v1209_v49 }
 0xb77   : > { %v1201_v48 = vpop.xlane.xlu1 %1200 }
 0xb78   : > { %v1205_v50 = vsub.f32 %v1191_v41, %v1201_v48 }
 0xb7a   : > { %v1725_v52 = vpop.eup %1724  ;;  %v1207_v60 = vmul.f32 1.442695, %v1205_v50 }
 0xb7b   : > { %v1214_v61 = vsel %vm462_vm2, %v1725_v52, 0.0 }
 0xb7c   : > { %1726 = vpow2.f32 %v1207_v60  ;;  %1215 = vadd.xlane.f32.xlu2 %v1214_v61 }
 0xb82   : > { %v1727_v53 = vpop.eup %1726 }
 0xb83   : > { %v1211_v54 = vsel %vm462_vm2, %v1727_v53, 0.0 }
 0xb84   : > { %1212 = vadd.xlane.f32.xlu0 %v1211_v54 }
 0xbe2   : > { %v1269_v43 = vpop.trf.xlu1 }
 0xbea   : > { %v1270_v27 = vpop.trf.xlu1 }
 0xbef   : > { %v1216_v18 = vpop.xlane.xlu2 %1215 }
 0xbf0   : > { %1728 = vrcp.f32 %v1216_v18  ;;  %v1243_v44 = vand.u32 2147483648, %v1216_v18  ;;  %v1241_v45 = vand.u32 2147483647, %v1216_v18  ;;  %vm1237_vm11 = vweird.f32 %v1216_v18 }
 0xbf2   : > { %v1244_v16 = vor.u32 1.1754944e-38, %v1243_v44  ;;  %vm1242_vm13 = vcmp.eq.f32.partialorder %v1241_v45, 8.507059e+37 }
 0xbf6   : > { %v1729_v55 = vpop.eup %1728 }
 0xbf7   : > { %v1233_v10 = vmul.f32 %v1729_v55, %v1216_v18  ;;  %v1213_v58 = vpop.xlane.xlu0 %1212  ;;  %vm1238_vm10 = vweird.f32 %v1729_v55 }
 0xbf8   : > { %1730 = vrcp.f32 %v1213_v58  ;;  %vm1239_vm12 = vmor %vm1237_vm11, %vm1238_vm10  ;;  %v1228_v57 = vand.u32 2147483648, %v1213_v58  ;;  %v1226_v30 = vand.u32 2147483647, %v1213_v58  ;;  %vm1222_vm15 = vweird.f32 %v1213_v58 }
 0xbf9   : > { %v1234_v42 = vsub.f32 1.0, %v1233_v10 }
 0xbfa   : > { %v1229_v35 = vor.u32 1.1754944e-38, %v1228_v57  ;;  %vm1227_vm4 = vcmp.eq.f32.partialorder %v1226_v30, 8.507059e+37 }
 0xbfb   : > { %v1235_v5 = vmul.f32 %v1729_v55, %v1234_v42 }
 0xbfd   : > { %v1236_v11 = vadd.f32 %v1729_v55, %v1235_v5 }
 0xbfe   : > { %v1731_v13 = vpop.eup %1730 }
 0xbff   : > { %v1240_v17 = vsel %vm1239_vm12, %v1729_v55, %v1236_v11  ;;  %v1218_v19 = vmul.f32 %v1731_v13, %v1213_v58  ;;  %vm1223_vm14 = vweird.f32 %v1731_v13 }
 0xc00   : > { %v1245_v22 = vsel %vm1242_vm13, %v1244_v16, %v1240_v17  ;;  %vm1224_vm3 = vmor %vm1222_vm15, %vm1223_vm14 }
 0xc01   : > { %v1246_v25 = vmul.f32 %v1725_v52, %v1245_v22  ;;  %v1219_v28 = vsub.f32 1.0, %v1218_v19 }
 0xc03   : > { %v1220_v29 = vmul.f32 %v1731_v13, %v1219_v28  ;;  %v1248_v20 = vsub.f32 %v1246_v25, %v1897_v51 }
 0xc05   : > { %v1221_v31 = vadd.f32 %v1731_v13, %v1220_v29  ;;  %v1250_v33 = vmul.f32 0.0, %v1248_v20 }
 0xc07   : > { %v1225_v36 = vsel %vm1224_vm3, %v1731_v13, %v1221_v31  ;;  %v1252_v37 = vmul.f32 0.125, %v1250_v33 }
 0xc08   : > { %v1230_v39 = vsel %vm1227_vm4, %v1229_v35, %v1225_v36 }
 0xc09   : > { %1305 = vmatpush.msrb.mxu0 %v1252_v37  ;;  %1337 = vmatpush.msrb.mxu2 %v1252_v37  ;;  %v1231_v40 = vmul.f32 %v1727_v53, %v1230_v39  ;;  %v1315_v51 = vsel %vm462_vm2, %v1252_v37, 0.0 }
 0xc0b   : > { %v1247_v41 = vsub.f32 %v1231_v40, %v1900_v3 }
 0xc0d   : > { %v1251_v47 = vmul.f32 0.125, %v1247_v41 }
 0xc0f   : > { %1306 = vmatpush.msrb.mxu0 %v1251_v47  ;;  %v1314_v34 = vsel %vm462_vm2, %v1251_v47, 0.0  ;;  %1338 = vmatpush.msrb.mxu2 %v1251_v47 }
 0xc10   : > { %v2097_v2 = vadd.f32 %v1315_v51, %v1314_v34  ;;  %1669 = vmatmul.msk.f32.vlgmr.msrb.gmra.mxu0 %vm342_vm0, %v1269_v43  ;;  %1671 = vmatmul.msk.f32.vlgmr.msrb.gmra.mxu2 %vm342_vm0, %v1902_v12 }
 0xc18   : > { %1670 = vmatmul.msk.f32.gmra.mxu0 %vm342_vm0, %v1270_v27  ;;  %1672 = vmatmul.msk.f32.gmra.mxu2 %vm342_vm0, %v1911_v21 }
 0xc8d   : > { %v1308_v3 = vpop.f32.mrf.mxu0 }
 0xc8e   : > { %v1433_v50 = vmul.f32 0.05, %v1308_v3 }
 0xc90   : > { %v1435_v60 = vsub.f32 %v2023_v1, %v1433_v50 }
 0xc93   : > { %v1340_v7 = vpop.f32.mrf.mxu2 }
 0xc94   : > { %1675 = vmatmul.msk.f32.vlgmr.msrb.gmra.mxu3 %vm462_vm2, %v1340_v7 }
 0xc95   : > { %v1311_v49 = vpop.f32.mrf.mxu0 }
 0xc96   : > { %v1434_v48 = vmul.f32 0.05, %v1311_v49 }
 0xc98   : > { %v1436_v52 = vsub.f32 %v2020_v0, %v1434_v48 }
 0xc9a   : > { %1513 = vmatpush.msra.mxu3 %v1436_v52 }
 0xc9b   : > { %v1343_v61 = vpop.f32.mrf.mxu2 }
 0xc9c   : > { %1676 = vmatmul.msk.f32.gmra.mxu3 %vm462_vm2, %v1343_v61 }
 0xc9d   : > { %1514 = vmatpush.msra.mxu3 %v1435_v60 }
 0xd17   : > { %v1375_v12 = vpop.f32.mrf.mxu3 }
 0xd18   : > { %v1383_v21 = vsel %vm1381_vm5, %v1375_v12, 0.0 }
 0xd19   : > { %v1414_v18 = vsel %vm342_vm0, %v1383_v21, 0.0 }
 0xd1f   : > { %v1378_v53 = vpop.f32.mrf.mxu3 }
 0xd20   : > { %v1384_v54 = vsel %vm1382_vm6, %v1378_v53, 0.0  ;;  %1677 = vmatpush.msk.msrb.mxu1 %vm1382_vm6, %v1378_v53 }
 0xd21   : > { %v1415_v0 = vsel %vm342_vm0, %v1384_v54, 0.0 }
 0xd22   : > { %v1416_v55 = vadd.f32 %v1415_v0, %v1414_v18  ;;  %1678 = vmatpush.msk.msrb.mxu1 %vm1381_vm5, %v1375_v12 }
 0xd23   : > { %1679 = vmatmul.msk.f32.vlgmr.msrb.gmra.mxu1 %vm342_vm0, %v1918_v26 }
 0xd2b   : > { %1680 = vmatmul.msk.f32.gmra.mxu1 %vm342_vm0, %v1925_v32 }
 0xd33   : > { %1681 = vmatmul.msk.f32.gmra.mxu1 %vm342_vm0, %v1929_v14 }
 0xd3b   : > { %1682 = vmatmul.msk.f32.gmra.mxu1 %vm342_vm0, %v1933_v15  ;;  %v1417_v15 = vrot.slane %v1416_v55, 4 }
 0xd3d   : > { %v1418_v11 = vadd.f32 %v1417_v15, %v1416_v55 }
 0xda0   : > { %v1402_v1 = vpop.f32.mrf.mxu1 }
 0xda1   : > { %v1423_v45 = vmul.f32 0.05, %v1402_v1 }
 0xda3   : > { %v1427_v14 = vsub.f32 %v2055_v63, %v1423_v45 }
 0xda8   : > { %v1405_v23 = vpop.f32.mrf.mxu1 }
 0xda9   : > { %v1424_v44 = vmul.f32 0.05, %v1405_v23 }
 0xdab   : > { %v1428_v32 = vsub.f32 %v2051_v62, %v1424_v44 }
 0xdb0   : > { %v1408_v24 = vpop.f32.mrf.mxu1 }
 0xdb1   : > { %v1425_v58 = vmul.f32 0.05, %v1408_v24 }
 0xdb3   : > { %v1429_v26 = vsub.f32 %v2047_v59, %v1425_v58 }
 0xdb8   : > { %v1411_v10 = vpop.f32.mrf.mxu1 }
 0xdb9   : > { %v1426_v42 = vmul.f32 0.05, %v1411_v10 }
 0xdbb   : > { %v1430_v5 = vsub.f32 %v2044_v56, %v1426_v42  ;;  %v1419_v56 = vrot.slane %v1418_v11, 2 }
 0xdbd   : > { %1454 = vmatpush.msra.mxu0 %v1430_v5  ;;  %v1420_v13 = vadd.f32 %v1419_v56, %v1418_v11 }
 0xdbf   : > { %1455 = vmatpush.msra.mxu0 %v1429_v26  ;;  %v1421_v16 = vrot.slane %v1420_v13, 1 }
 0xdc1   : > { %1456 = vmatpush.msra.mxu0 %v1428_v32  ;;  %v1422_v59 = vadd.f32 %v1421_v16, %v1420_v13 }
 0xdc3   : > { %1457 = vmatpush.msra.mxu0 %v1427_v14  ;;  %v1431_v17 = vmul.f32 0.05, %v1422_v59 }
 0xdc4   : > { %1683 = vmatmul.msk.f32.vlgmr.msra.gmra.mxu0 %vm375_vm1, %v1835_v8 }
 0xdc5   : > { %v1432_v62 = vsub.f32 %v2064_v46, %v1431_v17  ;;  %v1317_v46 = vrot.slane %v2097_v2, 4 }
 0xdc7   : > { %v1440_v22 = vperm.slane %v1432_v62, 0  ;;  %v1318_v30 = vadd.f32 %v1317_v46, %v2097_v2 }
 0xdc9   : > { %v1319_v20 = vrot.slane %v1318_v30, 2 }
 0xdcb   : > { %v1320_v31 = vadd.f32 %v1319_v20, %v1318_v30 }
 0xdcc   : > { %1684 = vmatmul.msk.f32.gmra.mxu0 %vm375_vm1, %v1839_v9 }
 0xdcd   : > { %v1321_v33 = vrot.slane %v1320_v31, 1 }
 0xdcf   : > { %v1322_v35 = vadd.f32 %v1321_v33, %v1320_v31 }
 0xe41   : > { %v1459_v19 = vpop.f32.mrf.mxu0 }
 0xe42   : > { %v1460_v25 = vadd.f32 %v1459_v19, %v1440_v22 }
 0xe44   : > { %v1465_v29 = vmax.f32 %v1460_v25, 0.0 }
 0xe49   : > { %v1462_v63 = vpop.f32.mrf.mxu0 }
 0xe4a   : > { %v1463_v28 = vadd.f32 %v1462_v63, %v1440_v22 }
 0xe4c   : > { %v1466_v57 = vmax.f32 %v1463_v28, 0.0 }
 0xe4e   : > { %1481 = vmatpush.msra.mxu2 %v1466_v57 }
 0xe50   : > { %1482 = vmatpush.msra.mxu2 %v1465_v29 }
 0xe51   : > { %1685 = vmatmul.msk.f32.vlgmr.msra.gmra.mxu2 %vm342_vm0, %v1819_v4  ;;  %v1437_v4 = vmul.f32 0.05, %v1322_v35 }
 0xe53   : > { %v1438_v36 = vsub.f32 %v2082_v38, %v1437_v4 }
 0xe59   : > { %1686 = vmatmul.msk.f32.gmra.mxu2 %vm342_vm0, %v1824_v6  ;;  %v1491_v6 = vperm.slane %v1438_v36, 0 }
 0xed4   : > { %v1484_v8 = vpop.f32.mrf.mxu2 }
 0xed5   : > { %1687 = vmatmul.msk.f32.vlgmr.msra.gmra.mxu3 %vm342_vm0, %v1484_v8 }
 0xedc   : > { %v1487_v9 = vpop.f32.mrf.mxu2 }
 0xedd   : > { %1688 = vmatmul.msk.f32.gmra.mxu3 %vm342_vm0, %v1487_v9 }
 0xf58   : > { %v1516_v37 = vpop.f32.mrf.mxu3 }
 0xf59   : > { %v1517_v39 = vadd.f32 %v1516_v37, %v1491_v6 }
 0xf5b   : > { %1689 = vst.msk [vmem:[%s1881_s8 + $0x30] sm:$0xff] %vm462_vm2, %v1517_v39 }
 0xf60   : > { %v1519_v40 = vpop.f32.mrf.mxu3 }
 0xf61   : > { %v1520_v41 = vadd.f32 %v1519_v40, %v1491_v6 }
 0xf63   : > { %1690 = vst.msk [vmem:[%s1881_s8 + $0x38] sm:$0xff] %vm462_vm2, %v1520_v41 }
 0xf64 PF: > { %s17_s24 = sadd.s32 1, %s1738_s24  }
 0xf65   : > { %p14_p4 = scmp.ge.s32.totalorder %s17_s24, 4  }
 0xf67   :  { %16 = sbr.rel (!%p14_p4) target bundleno = 1 (0x1), region = 87 }

</bundles_post_ra>
